<compile_context>
chip_gen: v5e
topology: v5e:2x2
jax: 0.10.0
libtpu: 0.0.40
codegen_flags: <defaults>
</compile_context>

<pallas_src>
import functools

import jax
import jax.numpy as jnp
from jax.experimental import pallas as pl
from jax.experimental.pallas import tpu as pltpu

WIN = 5
NUM_CLASSES = 2


# --------------------------------------------------------------------------- #
# Fused kernel: edge conv + binarize + log-softmax + 3-scalar reduction
# --------------------------------------------------------------------------- #
def _fused_label_smoothing_kernel(x_ref, t_ref, out_ref, pad_ref,
                                  *, N, C, H, W, win):
    p = (win - 1) // 2
    inv_c = 1.0 / float(C)

    # Zero-halo scratch for the separable box sum; zero once, then write the
    # interior for all batches (borders stay zero for every batch step).
    pad_ref[...] = jnp.zeros((N, H + 2 * p, W + 2 * p), jnp.float32)
    pad_ref[:, pl.ds(p, H), pl.ds(p, W)] = t_ref[...]

    acc_logpy = jnp.zeros((H, W), jnp.float32)   # sum log_p[y]
    acc_edget = jnp.zeros((H, W), jnp.float32)   # sum edge*(S - (2-1/C)*log_p[y])
    acc_edge = jnp.zeros((H, W), jnp.float32)    # sum edge

    for n in range(N):  # N is tiny and static -> fully unrolled
        t_n = t_ref[n]                 # (H, W) float integer-valued labels
        padv = pad_ref[n]              # (H+2p, W+2p) zero-padded labels

        # ---- separable 5x5 box sum (zero padding at the borders) ----
        csum = padv[:, 0:W]
        for dw in range(1, win):
            csum = csum + padv[:, dw:dw + W]           # (H+2p, W)
        box = csum[0:H, :]
        for dh in range(1, win):
            box = box + csum[dh:dh + H, :]             # (H, W)

        # edge-detect conv (weight = -1 everywhere, center = win*win - 1):
        #   conv = (win*win)*t - boxsum
        conv = float(win * win) * t_n - box
        edge = jnp.where(conv != 0.0, 1.0, 0.0).astype(jnp.float32)

        # ---- per-pixel log-softmax over channels ----
        if C == 2:
            # log_p0 = -softplus(x1-x0), log_p1 = -softplus(x0-x1)
            d = x_ref[n, 0] - x_ref[n, 1]
            lg = jnp.log(1.0 + jnp.exp(-jnp.abs(d)))
            log_p0 = -(lg + jnp.maximum(-d, 0.0))
            log_p1 = -(lg + jnp.maximum(d, 0.0))
            log_p_sum = log_p0 + log_p1
            log_p_y = jnp.where(t_n > 0.5, log_p1, log_p0)
        else:
            xs = [x_ref[n, c].astype(jnp.float32) for c in range(C)]
            m = xs[0]
            for c in range(1, C):
                m = jnp.maximum(m, xs[c])
            se = jnp.zeros((H, W), jnp.float32)
            for c in range(C):
                se = se + jnp.exp(xs[c] - m)
            lse = m + jnp.log(se)
            log_ps = [xs[c] - lse for c in range(C)]
            log_p_sum = log_ps[0]
            for c in range(1, C):
                log_p_sum = log_p_sum + log_ps[c]
            log_p_y = jnp.zeros((H, W), jnp.float32)
            for c in range(C):
                log_p_y = log_p_y + jnp.where(jnp.abs(t_n - float(c)) < 0.5,
                                              log_ps[c], 0.0)

        # Loss is linear in the smoothing factor s:
        #   sum_c w_c*log_p_c = log_p_y + s*edge*(sum_c log_p_c - (2-1/C)*log_p_y)
        acc_logpy = acc_logpy + log_p_y
        acc_edget = acc_edget + edge * (log_p_sum - (2.0 - inv_c) * log_p_y)
        acc_edge = acc_edge + edge

    # Single cross-lane reduction at the very end; outputs are 3 SMEM scalars.
    out_ref[0] = jnp.sum(acc_logpy)
    out_ref[1] = jnp.sum(acc_edget)
    out_ref[2] = jnp.sum(acc_edge)


# --------------------------------------------------------------------------- #
# Wrapper
# --------------------------------------------------------------------------- #
@functools.partial(jax.jit, static_argnames=("win", "num_classes"))
def label_smoothing_loss(x, target, win=WIN, num_classes=NUM_CLASSES):
    """x: (N, C, H, W) f32 logits; target: (N, 1, H, W) f32 integer labels."""
    N, C, H, W = x.shape
    assert C == num_classes

    p = (win - 1) // 2
    # Free layout op: squeeze the channel dim (no pad, no int32 copy).
    t = target.reshape(N, H, W).astype(jnp.float32)

    kern = functools.partial(_fused_label_smoothing_kernel,
                             N=N, C=C, H=H, W=W, win=win)
    sums = pl.pallas_call(
        kern,
        out_shape=jax.ShapeDtypeStruct((3,), jnp.float32),
        in_specs=[
            pl.BlockSpec(memory_space=pltpu.MemorySpace.VMEM),   # logits
            pl.BlockSpec(memory_space=pltpu.MemorySpace.VMEM),   # labels
        ],
        out_specs=pl.BlockSpec(memory_space=pltpu.MemorySpace.SMEM),
        scratch_shapes=[pltpu.VMEM((N, H + 2 * p, W + 2 * p), jnp.float32)],
    )(x.astype(jnp.float32), t)

    total_px = jnp.float32(N * H * W)
    sum_logpy = sums[0]
    sum_edget = sums[1]
    edge_sum = sums[2]

    # dynamic smoothing = mean(edge_mask), clipped at 0.2 (PyTorch: if >0.2 -> 0.2)
    smoothing = jnp.minimum(edge_sum / total_px, jnp.float32(0.2))
    loss = -(sum_logpy + smoothing * sum_edget) / total_px
    return loss, smoothing


# --------------------------------------------------------------------------- #
# Pure-JAX reference (for correctness check only)
# --------------------------------------------------------------------------- #
def reference(x, target, win=WIN, num_classes=NUM_CLASSES):
    N, C, H, W = x.shape
    p = (win - 1) // 2
    weight = -jnp.ones((1, 1, win, win), jnp.float32)
    weight = weight.at[0, 0, win // 2, win // 2].set(float(win * win - 1))
    conv = jax.lax.conv_general_dilated(
        target.astype(jnp.float32), weight, (1, 1), [(p, p), (p, p)],
        dimension_numbers=("NCHW", "OIHW", "NCHW"))
    edge = (conv != 0).astype(jnp.float32)            # (N, 1, H, W)
    s = jnp.minimum(jnp.mean(edge), 0.2)
    log_p = jax.nn.log_softmax(x, axis=1)
    y = target[:, 0].astype(jnp.int32)
    onehot = jax.nn.one_hot(y, C, axis=1, dtype=jnp.float32)   # (N, C, H, W)
    soft = onehot * (1.0 - s + s / C) + (1.0 - onehot) * s
    w = onehot * (1.0 - edge) + soft * edge
    return -jnp.mean(jnp.sum(w * log_p, axis=1))


if __name__ == "__main__":
    key = jax.random.PRNGKey(0)
    kx, kt = jax.random.split(key)
    N, C, H, W = 2, NUM_CLASSES, 16, 16
    x = jax.random.normal(kx, (N, C, H, W), dtype=jnp.float32)
    labels = jax.random.randint(kt, (N, 1, H, W), 0, C)
    target = labels.astype(jnp.float32)   # PyTorch feeds float labels to Conv2d

    loss, smoothing = label_smoothing_loss(x, target)
    loss = jax.block_until_ready(loss)

    ref = reference(x, target)
    assert abs(float(loss) - float(ref)) < 1e-4, (float(loss), float(ref))
    print("KERNEL_OK")
</pallas_src>

<mosaic_0001>
module attributes {stable_mosaic.version = 11 : i64} {
  func.func @_fused_label_smoothing_kernel(%arg0: memref<2x2x16x16xf32, #tpu.memory_space<vmem>>, %arg1: memref<2x16x16xf32, #tpu.memory_space<vmem>>, %arg2: memref<3xf32, #tpu.memory_space<smem>>, %arg3: memref<2x20x20xf32, #tpu.memory_space<vmem>>) attributes {dimension_semantics = [], scalar_prefetch = 0 : i64, scratch_operands = 1 : i64, tpu.core_type = #tpu.core_type<tc>} {
    %cst = arith.constant 0.000000e+00 : f32
    %0 = vector.broadcast %cst : f32 to vector<2x20x20xf32>
    %c0 = arith.constant 0 : index
    %c0_0 = arith.constant 0 : index
    %c0_1 = arith.constant 0 : index
    %1 = vector.load %arg3[%c0, %c0_0, %c0_1] : memref<2x20x20xf32, #tpu.memory_space<vmem>>, vector<2x20x20xf32>
    tpu.vector_store %arg3[%c0, %c0_0, %c0_1], %0 {strides = array<i32>} : memref<2x20x20xf32, #tpu.memory_space<vmem>>, vector<2x20x20xf32>,
    %c0_2 = arith.constant 0 : index
    %c0_3 = arith.constant 0 : index
    %c0_4 = arith.constant 0 : index
    %2 = vector.load %arg1[%c0_2, %c0_3, %c0_4] : memref<2x16x16xf32, #tpu.memory_space<vmem>>, vector<2x16x16xf32>
    %c0_5 = arith.constant 0 : index
    %c2 = arith.constant 2 : index
    %c2_6 = arith.constant 2 : index
    %3 = vector.load %arg3[%c0_5, %c2, %c2_6] : memref<2x20x20xf32, #tpu.memory_space<vmem>>, vector<2x16x16xf32>
    tpu.vector_store %arg3[%c0_5, %c2, %c2_6], %2 {strides = array<i32>} : memref<2x20x20xf32, #tpu.memory_space<vmem>>, vector<2x16x16xf32>,
    %cst_7 = arith.constant 0.000000e+00 : f32
    %4 = vector.broadcast %cst_7 : f32 to vector<16x16xf32>
    %cst_8 = arith.constant 0.000000e+00 : f32
    %5 = vector.broadcast %cst_8 : f32 to vector<16x16xf32>
    %cst_9 = arith.constant 0.000000e+00 : f32
    %6 = vector.broadcast %cst_9 : f32 to vector<16x16xf32>
    %c0_10 = arith.constant 0 : index
    %c0_11 = arith.constant 0 : index
    %c0_12 = arith.constant 0 : index
    %7 = vector.load %arg1[%c0_10, %c0_11, %c0_12] : memref<2x16x16xf32, #tpu.memory_space<vmem>>, vector<1x16x16xf32>
    %8 = vector.shape_cast %7 : vector<1x16x16xf32> to vector<16x16xf32>
    %c0_13 = arith.constant 0 : index
    %c0_14 = arith.constant 0 : index
    %c0_15 = arith.constant 0 : index
    %9 = vector.load %arg3[%c0_13, %c0_14, %c0_15] : memref<2x20x20xf32, #tpu.memory_space<vmem>>, vector<1x20x20xf32>
    %10 = vector.shape_cast %9 : vector<1x20x20xf32> to vector<20x20xf32>
    %11 = vector.extract_strided_slice %10 {offsets = [0, 0], sizes = [20, 16], strides = [1, 1]} : vector<20x20xf32> to vector<20x16xf32>
    %12 = vector.extract_strided_slice %10 {offsets = [0, 1], sizes = [20, 16], strides = [1, 1]} : vector<20x20xf32> to vector<20x16xf32>
    %13 = arith.addf %11, %12 : vector<20x16xf32>
    %14 = vector.extract_strided_slice %10 {offsets = [0, 2], sizes = [20, 16], strides = [1, 1]} : vector<20x20xf32> to vector<20x16xf32>
    %15 = arith.addf %13, %14 : vector<20x16xf32>
    %16 = vector.extract_strided_slice %10 {offsets = [0, 3], sizes = [20, 16], strides = [1, 1]} : vector<20x20xf32> to vector<20x16xf32>
    %17 = arith.addf %15, %16 : vector<20x16xf32>
    %18 = vector.extract_strided_slice %10 {offsets = [0, 4], sizes = [20, 16], strides = [1, 1]} : vector<20x20xf32> to vector<20x16xf32>
    %19 = arith.addf %17, %18 : vector<20x16xf32>
    %20 = vector.extract_strided_slice %19 {offsets = [0, 0], sizes = [16, 16], strides = [1, 1]} : vector<20x16xf32> to vector<16x16xf32>
    %21 = vector.extract_strided_slice %19 {offsets = [1, 0], sizes = [16, 16], strides = [1, 1]} : vector<20x16xf32> to vector<16x16xf32>
    %22 = arith.addf %20, %21 : vector<16x16xf32>
    %23 = vector.extract_strided_slice %19 {offsets = [2, 0], sizes = [16, 16], strides = [1, 1]} : vector<20x16xf32> to vector<16x16xf32>
    %24 = arith.addf %22, %23 : vector<16x16xf32>
    %25 = vector.extract_strided_slice %19 {offsets = [3, 0], sizes = [16, 16], strides = [1, 1]} : vector<20x16xf32> to vector<16x16xf32>
    %26 = arith.addf %24, %25 : vector<16x16xf32>
    %27 = vector.extract_strided_slice %19 {offsets = [4, 0], sizes = [16, 16], strides = [1, 1]} : vector<20x16xf32> to vector<16x16xf32>
    %28 = arith.addf %26, %27 : vector<16x16xf32>
    %cst_16 = arith.constant 2.500000e+01 : f32
    %29 = vector.broadcast %cst_16 : f32 to vector<16x16xf32>
    %30 = arith.mulf %29, %8 : vector<16x16xf32>
    %31 = arith.subf %30, %28 : vector<16x16xf32>
    %cst_17 = arith.constant 0.000000e+00 : f32
    %32 = vector.broadcast %cst_17 : f32 to vector<16x16xf32>
    %33 = arith.cmpf one, %31, %32 : vector<16x16xf32>
    %cst_18 = arith.constant 1.000000e+00 : f32
    %cst_19 = arith.constant 0.000000e+00 : f32
    %34 = vector.broadcast %cst_18 : f32 to vector<16x16xf32>
    %35 = vector.broadcast %cst_19 : f32 to vector<16x16xf32>
    %36 = arith.select %33, %34, %35 : vector<16x16xi1>, vector<16x16xf32>
    %c0_20 = arith.constant 0 : index
    %c0_21 = arith.constant 0 : index
    %c0_22 = arith.constant 0 : index
    %c0_23 = arith.constant 0 : index
    %37 = vector.load %arg0[%c0_20, %c0_21, %c0_22, %c0_23] : memref<2x2x16x16xf32, #tpu.memory_space<vmem>>, vector<1x1x16x16xf32>
    %38 = vector.shape_cast %37 : vector<1x1x16x16xf32> to vector<16x16xf32>
    %c0_24 = arith.constant 0 : index
    %c1 = arith.constant 1 : index
    %c0_25 = arith.constant 0 : index
    %c0_26 = arith.constant 0 : index
    %39 = vector.load %arg0[%c0_24, %c1, %c0_25, %c0_26] : memref<2x2x16x16xf32, #tpu.memory_space<vmem>>, vector<1x1x16x16xf32>
    %40 = vector.shape_cast %39 : vector<1x1x16x16xf32> to vector<16x16xf32>
    %41 = arith.subf %38, %40 : vector<16x16xf32>
    %42 = math.absf %41 : vector<16x16xf32>
    %cst_27 = arith.constant 0.000000e+00 : f32
    %43 = vector.broadcast %cst_27 : f32 to vector<16x16xf32>
    %44 = arith.subf %43, %42 : vector<16x16xf32>
    %45 = math.exp %44 : vector<16x16xf32>
    %cst_28 = arith.constant 1.000000e+00 : f32
    %46 = vector.broadcast %cst_28 : f32 to vector<16x16xf32>
    %47 = arith.addf %46, %45 : vector<16x16xf32>
    %48 = math.log %47 : vector<16x16xf32>
    %cst_29 = arith.constant 0.000000e+00 : f32
    %49 = vector.broadcast %cst_29 : f32 to vector<16x16xf32>
    %50 = arith.subf %49, %41 : vector<16x16xf32>
    %cst_30 = arith.constant 0.000000e+00 : f32
    %51 = vector.broadcast %cst_30 : f32 to vector<16x16xf32>
    %52 = arith.maximumf %50, %51 : vector<16x16xf32>
    %53 = arith.addf %48, %52 : vector<16x16xf32>
    %cst_31 = arith.constant 0.000000e+00 : f32
    %54 = vector.broadcast %cst_31 : f32 to vector<16x16xf32>
    %55 = arith.subf %54, %53 : vector<16x16xf32>
    %cst_32 = arith.constant 0.000000e+00 : f32
    %56 = vector.broadcast %cst_32 : f32 to vector<16x16xf32>
    %57 = arith.maximumf %41, %56 : vector<16x16xf32>
    %58 = arith.addf %48, %57 : vector<16x16xf32>
    %cst_33 = arith.constant 0.000000e+00 : f32
    %59 = vector.broadcast %cst_33 : f32 to vector<16x16xf32>
    %60 = arith.subf %59, %58 : vector<16x16xf32>
    %61 = arith.addf %55, %60 : vector<16x16xf32>
    %cst_34 = arith.constant 5.000000e-01 : f32
    %62 = vector.broadcast %cst_34 : f32 to vector<16x16xf32>
    %63 = arith.cmpf ogt, %8, %62 : vector<16x16xf32>
    %64 = arith.select %63, %60, %55 : vector<16x16xi1>, vector<16x16xf32>
    %65 = arith.addf %4, %64 : vector<16x16xf32>
    %cst_35 = arith.constant 1.500000e+00 : f32
    %66 = vector.broadcast %cst_35 : f32 to vector<16x16xf32>
    %67 = arith.mulf %66, %64 : vector<16x16xf32>
    %68 = arith.subf %61, %67 : vector<16x16xf32>
    %69 = arith.mulf %36, %68 : vector<16x16xf32>
    %70 = arith.addf %5, %69 : vector<16x16xf32>
    %71 = arith.addf %6, %36 : vector<16x16xf32>
    %c1_36 = arith.constant 1 : index
    %c0_37 = arith.constant 0 : index
    %c0_38 = arith.constant 0 : index
    %72 = vector.load %arg1[%c1_36, %c0_37, %c0_38] : memref<2x16x16xf32, #tpu.memory_space<vmem>>, vector<1x16x16xf32>
    %73 = vector.shape_cast %72 : vector<1x16x16xf32> to vector<16x16xf32>
    %c1_39 = arith.constant 1 : index
    %c0_40 = arith.constant 0 : index
    %c0_41 = arith.constant 0 : index
    %74 = vector.load %arg3[%c1_39, %c0_40, %c0_41] : memref<2x20x20xf32, #tpu.memory_space<vmem>>, vector<1x20x20xf32>
    %75 = vector.shape_cast %74 : vector<1x20x20xf32> to vector<20x20xf32>
    %76 = vector.extract_strided_slice %75 {offsets = [0, 0], sizes = [20, 16], strides = [1, 1]} : vector<20x20xf32> to vector<20x16xf32>
    %77 = vector.extract_strided_slice %75 {offsets = [0, 1], sizes = [20, 16], strides = [1, 1]} : vector<20x20xf32> to vector<20x16xf32>
    %78 = arith.addf %76, %77 : vector<20x16xf32>
    %79 = vector.extract_strided_slice %75 {offsets = [0, 2], sizes = [20, 16], strides = [1, 1]} : vector<20x20xf32> to vector<20x16xf32>
    %80 = arith.addf %78, %79 : vector<20x16xf32>
    %81 = vector.extract_strided_slice %75 {offsets = [0, 3], sizes = [20, 16], strides = [1, 1]} : vector<20x20xf32> to vector<20x16xf32>
    %82 = arith.addf %80, %81 : vector<20x16xf32>
    %83 = vector.extract_strided_slice %75 {offsets = [0, 4], sizes = [20, 16], strides = [1, 1]} : vector<20x20xf32> to vector<20x16xf32>
    %84 = arith.addf %82, %83 : vector<20x16xf32>
    %85 = vector.extract_strided_slice %84 {offsets = [0, 0], sizes = [16, 16], strides = [1, 1]} : vector<20x16xf32> to vector<16x16xf32>
    %86 = vector.extract_strided_slice %84 {offsets = [1, 0], sizes = [16, 16], strides = [1, 1]} : vector<20x16xf32> to vector<16x16xf32>
    %87 = arith.addf %85, %86 : vector<16x16xf32>
    %88 = vector.extract_strided_slice %84 {offsets = [2, 0], sizes = [16, 16], strides = [1, 1]} : vector<20x16xf32> to vector<16x16xf32>
    %89 = arith.addf %87, %88 : vector<16x16xf32>
    %90 = vector.extract_strided_slice %84 {offsets = [3, 0], sizes = [16, 16], strides = [1, 1]} : vector<20x16xf32> to vector<16x16xf32>
    %91 = arith.addf %89, %90 : vector<16x16xf32>
    %92 = vector.extract_strided_slice %84 {offsets = [4, 0], sizes = [16, 16], strides = [1, 1]} : vector<20x16xf32> to vector<16x16xf32>
    %93 = arith.addf %91, %92 : vector<16x16xf32>
    %cst_42 = arith.constant 2.500000e+01 : f32
    %94 = vector.broadcast %cst_42 : f32 to vector<16x16xf32>
    %95 = arith.mulf %94, %73 : vector<16x16xf32>
    %96 = arith.subf %95, %93 : vector<16x16xf32>
    %cst_43 = arith.constant 0.000000e+00 : f32
    %97 = vector.broadcast %cst_43 : f32 to vector<16x16xf32>
    %98 = arith.cmpf one, %96, %97 : vector<16x16xf32>
    %cst_44 = arith.constant 1.000000e+00 : f32
    %cst_45 = arith.constant 0.000000e+00 : f32
    %99 = vector.broadcast %cst_44 : f32 to vector<16x16xf32>
    %100 = vector.broadcast %cst_45 : f32 to vector<16x16xf32>
    %101 = arith.select %98, %99, %100 : vector<16x16xi1>, vector<16x16xf32>
    %c1_46 = arith.constant 1 : index
    %c0_47 = arith.constant 0 : index
    %c0_48 = arith.constant 0 : index
    %c0_49 = arith.constant 0 : index
    %102 = vector.load %arg0[%c1_46, %c0_47, %c0_48, %c0_49] : memref<2x2x16x16xf32, #tpu.memory_space<vmem>>, vector<1x1x16x16xf32>
    %103 = vector.shape_cast %102 : vector<1x1x16x16xf32> to vector<16x16xf32>
    %c1_50 = arith.constant 1 : index
    %c1_51 = arith.constant 1 : index
    %c0_52 = arith.constant 0 : index
    %c0_53 = arith.constant 0 : index
    %104 = vector.load %arg0[%c1_50, %c1_51, %c0_52, %c0_53] : memref<2x2x16x16xf32, #tpu.memory_space<vmem>>, vector<1x1x16x16xf32>
    %105 = vector.shape_cast %104 : vector<1x1x16x16xf32> to vector<16x16xf32>
    %106 = arith.subf %103, %105 : vector<16x16xf32>
    %107 = math.absf %106 : vector<16x16xf32>
    %cst_54 = arith.constant 0.000000e+00 : f32
    %108 = vector.broadcast %cst_54 : f32 to vector<16x16xf32>
    %109 = arith.subf %108, %107 : vector<16x16xf32>
    %110 = math.exp %109 : vector<16x16xf32>
    %cst_55 = arith.constant 1.000000e+00 : f32
    %111 = vector.broadcast %cst_55 : f32 to vector<16x16xf32>
    %112 = arith.addf %111, %110 : vector<16x16xf32>
    %113 = math.log %112 : vector<16x16xf32>
    %cst_56 = arith.constant 0.000000e+00 : f32
    %114 = vector.broadcast %cst_56 : f32 to vector<16x16xf32>
    %115 = arith.subf %114, %106 : vector<16x16xf32>
    %cst_57 = arith.constant 0.000000e+00 : f32
    %116 = vector.broadcast %cst_57 : f32 to vector<16x16xf32>
    %117 = arith.maximumf %115, %116 : vector<16x16xf32>
    %118 = arith.addf %113, %117 : vector<16x16xf32>
    %cst_58 = arith.constant 0.000000e+00 : f32
    %119 = vector.broadcast %cst_58 : f32 to vector<16x16xf32>
    %120 = arith.subf %119, %118 : vector<16x16xf32>
    %cst_59 = arith.constant 0.000000e+00 : f32
    %121 = vector.broadcast %cst_59 : f32 to vector<16x16xf32>
    %122 = arith.maximumf %106, %121 : vector<16x16xf32>
    %123 = arith.addf %113, %122 : vector<16x16xf32>
    %cst_60 = arith.constant 0.000000e+00 : f32
    %124 = vector.broadcast %cst_60 : f32 to vector<16x16xf32>
    %125 = arith.subf %124, %123 : vector<16x16xf32>
    %126 = arith.addf %120, %125 : vector<16x16xf32>
    %cst_61 = arith.constant 5.000000e-01 : f32
    %127 = vector.broadcast %cst_61 : f32 to vector<16x16xf32>
    %128 = arith.cmpf ogt, %73, %127 : vector<16x16xf32>
    %129 = arith.select %128, %125, %120 : vector<16x16xi1>, vector<16x16xf32>
    %130 = arith.addf %65, %129 : vector<16x16xf32>
    %cst_62 = arith.constant 1.500000e+00 : f32
    %131 = vector.broadcast %cst_62 : f32 to vector<16x16xf32>
    %132 = arith.mulf %131, %129 : vector<16x16xf32>
    %133 = arith.subf %126, %132 : vector<16x16xf32>
    %134 = arith.mulf %101, %133 : vector<16x16xf32>
    %135 = arith.addf %70, %134 : vector<16x16xf32>
    %136 = arith.addf %71, %101 : vector<16x16xf32>
    %137 = vector.shape_cast %130 : vector<16x16xf32> to vector<1x16x16xf32>
    %cst_63 = arith.constant dense<0.000000e+00> : vector<1xf32>
    %138 = vector.multi_reduction <add>, %137, %cst_63 [1, 2] : vector<1x16x16xf32> to vector<1xf32>
    %139 = vector.shape_cast %138 : vector<1xf32> to vector<1x1x1xf32>
    %140 = vector.extract %139[0, 0, 0] : f32 from vector<1x1x1xf32>
    %c0_64 = arith.constant 0 : index
    %141 = memref.load %arg2[%c0_64] : memref<3xf32, #tpu.memory_space<smem>>
    memref.store %140, %arg2[%c0_64] : memref<3xf32, #tpu.memory_space<smem>>
    %142 = vector.shape_cast %135 : vector<16x16xf32> to vector<1x16x16xf32>
    %cst_65 = arith.constant dense<0.000000e+00> : vector<1xf32>
    %143 = vector.multi_reduction <add>, %142, %cst_65 [1, 2] : vector<1x16x16xf32> to vector<1xf32>
    %144 = vector.shape_cast %143 : vector<1xf32> to vector<1x1x1xf32>
    %145 = vector.extract %144[0, 0, 0] : f32 from vector<1x1x1xf32>
    %c1_66 = arith.constant 1 : index
    %146 = memref.load %arg2[%c1_66] : memref<3xf32, #tpu.memory_space<smem>>
    memref.store %145, %arg2[%c1_66] : memref<3xf32, #tpu.memory_space<smem>>
    %147 = vector.shape_cast %136 : vector<16x16xf32> to vector<1x16x16xf32>
    %cst_67 = arith.constant dense<0.000000e+00> : vector<1xf32>
    %148 = vector.multi_reduction <add>, %147, %cst_67 [1, 2] : vector<1x16x16xf32> to vector<1xf32>
    %149 = vector.shape_cast %148 : vector<1xf32> to vector<1x1x1xf32>
    %150 = vector.extract %149[0, 0, 0] : f32 from vector<1x1x1xf32>
    %c2_68 = arith.constant 2 : index
    %151 = memref.load %arg2[%c2_68] : memref<3xf32, #tpu.memory_space<smem>>
    memref.store %150, %arg2[%c2_68] : memref<3xf32, #tpu.memory_space<smem>>
    return
  }
}

</mosaic_0001>

<bundles_post_ra>
// kernel: label_smoothing_loss.1
= control target key start
LH: loop header
LB: loop body
LE: loop exit
PB: predicated region body
PF: predicated region fallthrough
CT: control target
= control target key end

     0   :  { %7 = vsyncpa [#allocation4], 0  ;;  %s844_s0 = inlined_call_operand.hbm [shape: f32[2,2,16,16], index: 0, kind: input, shape index: {}]   ;;  %s845_s1 = inlined_call_operand.hbm [shape: f32[2,16,16], index: 1, kind: input, shape index: {}]   ;;  %s846_s2 = inlined_call_operand.vmem [shape: f32[3], index: 2, kind: output, shape index: {}]  }
   0x1   :  { %8 = vsyncpa [#allocation7], 0 }
   0x2   :  { %9 = vsyncpa [#allocation5], 0  ;;  %s14_s11 = sshll.u32 %s844_s0, 4  ;;  %s555_s12 = smov [#allocation3]   ;;  %s15_s11 = int_to_ptr.hbm [resolvable:$true] %s14_s11 }
   0x3   :  { %s16_s13 = sshll.u32 %s555_s12, 4  ;;  %s27_s16 = sshll.u32 %s845_s1, 4  ;;  %s17_s13 = int_to_ptr.vmem [resolvable:$true] %s16_s13  ;;  %s28_s16 = int_to_ptr.hbm [resolvable:$true] %s27_s16 }
   0x4   :  { %s556_s17 = smov 128   ;;  %s557_s18 = smov 8  }
   0x5   :  { %22 = dma.hbm_to_vmem [thread:$0]  %s15_s11, 1024, %s17_s13, [#allocation4], %s556_s17, %s556_s17, %s557_s18  }
   0x6   :  { %s558_s19 = smov [#allocation6]  }
   0x7   :  { %s29_s20 = sshll.u32 %s558_s19, 4  ;;  %s30_s20 = int_to_ptr.vmem [resolvable:$true] %s29_s20 }
   0x8   :  { %35 = dma.hbm_to_vmem [thread:$0]  %s28_s16, 512, %s30_s20, [#allocation7], %s556_s17, %s556_s17, %s557_s18  }
   0x9   :  { %549 = dma.done.wait [#allocation4], 1024  }
   0xa   :  { %550 = vsyncadd [#allocation4], 4294966272 }
   0xb   :  { %551 = dma.done.wait [#allocation7], 512  }
   0xc   :  { %552 = vsyncadd [#allocation7], 4294966784  ;;  %vm44_vm0 = vcmask 162816   ;;  %v559_v0 = vmov 0.0   ;;  %v591_v1 = vld [vmem:[#allocation6 + $0x10] sm:$0xff]  ;;  %v593_v2 = vld [vmem:[#allocation6] sm:$0xff] }
   0xd   :  { %49 = vst.msk [vmem:[#allocation2 + $0x18] sm:$0xff] %vm44_vm0, %v559_v0  ;;  %s560_s0 = smov 2   ;;  %v597_v3 = vld [vmem:[#allocation6 + $0x18] sm:$0xff]  ;;  %v599_v4 = vld [vmem:[#allocation6 + $0x8] sm:$0xff]  ;;  %vm47_vm1 = vcmask 158720   ;;  %vm72_vm2 = vcmask 146448  }
   0xe   :  { %50 = vst.msk [vmem:[#allocation2 + $0x20] sm:$0xff] %vm44_vm0, %v559_v0  ;;  %64 = vrot.lane.b32.xlu1 %v591_v1, %s560_s0  ;;  %60 = vrot.lane.b32.xlu0 %v593_v2, %s560_s0  ;;  %s561_s1 = smov 127   ;;  %s562_s21 = smov 126   ;;  %v184_v17 = vld [vmem:[#allocation3] sm:$0xff]  ;;  %v187_v18 = vld [vmem:[#allocation3 + $0x10] sm:$0xff]  ;;  %v185_v32 = vld [vmem:[#allocation3 + $0x8] sm:$0xff] }
   0xf   :  { %45 = vst.msk [vmem:[#allocation2] sm:$0xff] %vm44_vm0, %v559_v0  ;;  %s563_s22 = smov 125   ;;  %s564_s23 = smov 124   ;;  %v647_v20 = vsub.f32 %v184_v17, %v187_v18  ;;  %v343_v22 = vld [vmem:[#allocation3 + $0x20] sm:$0xff]  ;;  %v346_v23 = vld [vmem:[#allocation3 + $0x30] sm:$0xff]  ;;  %v188_v33 = vld [vmem:[#allocation3 + $0x18] sm:$0xff] }
  0x10   :  { %46 = vst.msk [vmem:[#allocation2 + $0x8] sm:$0xff] %vm44_vm0, %v559_v0  ;;  %v652_v25 = vsub.f32 %v343_v22, %v346_v23  ;;  %v659_v35 = vsub.f32 %v185_v32, %v188_v33  ;;  %v344_v42 = vld [vmem:[#allocation3 + $0x28] sm:$0xff]  ;;  %v347_v43 = vld [vmem:[#allocation3 + $0x38] sm:$0xff]  ;;  %vm221_vm3 = vcmp.gt.f32.partialorder %v593_v2, 0.5  ;;  %vm380_vm4 = vcmp.gt.f32.partialorder %v591_v1, 0.5  ;;  %s444_s27 = sshll.u32 %s846_s2, 4  ;;  %s445_s27 = int_to_ptr.vmem [resolvable:$true] %s444_s27 }
  0x11   :  { %51 = vst.msk [vmem:[#allocation2 + $0x28] sm:$0xf] %vm47_vm1, %v559_v0  ;;  %v191_v21 = vand.u32 2147483647, %v647_v20  ;;  %v672_v48 = vsub.f32 %v344_v42, %v347_v43  ;;  %v205_v59 = vsub.f32 0.0, %v647_v20  ;;  %vm222_vm5 = vcmp.gt.f32.partialorder %v599_v4, 0.5 }
  0x12   :  { %48 = vst.msk [vmem:[#allocation2 + $0x10] sm:$0xf] %vm47_vm1, %v559_v0  ;;  %v350_v28 = vand.u32 2147483647, %v652_v25  ;;  %v192_v38 = vand.u32 2147483647, %v659_v35 }
  0x13   :  { %v193_v27 = vsub.f32 0.0, %v191_v21  ;;  %v351_v50 = vand.u32 2147483647, %v672_v48  ;;  %v364_v61 = vsub.f32 0.0, %v652_v25  ;;  %v372_v21 = vmax.f32 %v652_v25, 0.0  ;;  %s565_s30 = smov [#allocation8]  }
  0x14   :  { %v352_v29 = vsub.f32 0.0, %v350_v28  ;;  %v194_v39 = vsub.f32 0.0, %v192_v38  ;;  %v206_v23 = vsub.f32 0.0, %v659_v35  ;;  %v365_v43 = vsub.f32 0.0, %v672_v48 }
  0x15   :  { %v195_v30 = vmul.f32 1.442695, %v193_v27  ;;  %v353_v52 = vsub.f32 0.0, %v351_v50  ;;  %v366_v18 = vmax.f32 %v364_v61, 0.0  ;;  %vm381_vm6 = vcmp.gt.f32.partialorder %v597_v3, 0.5 }
  0x16   :  { %66 = vrot.lane.b32.xlu1 %v597_v3, %s560_s0  ;;  %62 = vrot.lane.b32.xlu0 %v599_v4, %s560_s0  ;;  %v354_v31 = vmul.f32 1.442695, %v352_v29  ;;  %v197_v40 = vmul.f32 1.442695, %v194_v39  ;;  %v208_v39 = vmax.f32 %v206_v23, 0.0  ;;  %vm136_vm7 = vcmask 1046528  }
  0x17   :  { %473 = vpow2.f32 %v195_v30  ;;  %v356_v54 = vmul.f32 1.442695, %v353_v52  ;;  %vm396_vm8 = vcmask 130048   ;;  %vm146_vm9 = vcmask 1045504  }
  0x18   :  { %475 = vpow2.f32 %v354_v31  ;;  %vm156_vm10 = vcmask 1044480   ;;  %vm166_vm11 = vcmask 1043456  }
  0x19   :  { %477 = vpow2.f32 %v197_v40  ;;  %v214_v40 = vmax.f32 %v659_v35, 0.0 }
  0x1d   :  { %v474_v41 = vpop.eup %473 }
  0x1e   :  { %v476_v44 = vpop.eup %475  ;;  %v199_v49 = vadd.f32 1.0, %v474_v41 }
  0x1f   :  { %v358_v51 = vadd.f32 1.0, %v476_v44  ;;  %v478_v53 = vpop.eup %477 }
  0x20   :  { %479 = vlog2.f32 %v199_v49  ;;  %v200_v56 = vadd.f32 1.0, %v478_v53  ;;  %v373_v49 = vmax.f32 %v672_v48, 0.0 }
  0x21   :  { %481 = vlog2.f32 %v358_v51 }
  0x22   :  { %483 = vpow2.f32 %v356_v54 }
  0x23   :  { %485 = vlog2.f32 %v200_v56 }
  0x26   :  { %v480_v60 = vpop.eup %479 }
  0x27   :  { %v482_v62 = vpop.eup %481  ;;  %v202_v63 = vmul.f32 0.6931472, %v480_v60 }
  0x28   :  { %v361_v17 = vmul.f32 0.6931472, %v482_v62 }
  0x2a   :  { %v690_v32 = vadd.f32 %v366_v18, %v361_v17  ;;  %v692_v33 = vadd.f32 %v372_v21, %v361_v17 }
  0x2c   :  { %v370_v35 = vsub.f32 0.0, %v690_v32 }
  0x80   :  { %v65_v5 = vpop.permute.xlu1 %64  ;;  %v61_v6 = vpop.permute.xlu0 %60 }
  0x81   :  { %75 = vst.msk [vmem:[#allocation2 + $0x1a] sm:$0xff] %vm72_vm2, %v65_v5  ;;  %v207_v5 = vmax.f32 %v205_v59, 0.0 }
  0x82   :  { %73 = vst.msk [vmem:[#allocation2 + $0x2] sm:$0xff] %vm72_vm2, %v61_v6  ;;  %v213_v6 = vmax.f32 %v647_v20, 0.0 }
  0x83   :  { %v684_v30 = vadd.f32 %v207_v5, %v202_v63 }
  0x84   :  { %v686_v31 = vadd.f32 %v213_v6, %v202_v63 }
  0x85   :  { %v211_v44 = vsub.f32 0.0, %v684_v30 }
  0x88   :  { %v67_v7 = vpop.permute.xlu1 %66  ;;  %v63_v8 = vpop.permute.xlu0 %62  ;;  %v605_v9 = vld [vmem:[#allocation2 + $0x18] sm:$0xff] }
  0x89   :  { %76 = vst.msk [vmem:[#allocation2 + $0x22] sm:$0xff] %vm72_vm2, %v67_v7  ;;  %247 = vrot.lane.b32.xlu1 %v605_v9, %s561_s1  ;;  %v608_v10 = vld [vmem:[#allocation2] sm:$0xff]  ;;  %v484_v7 = vpop.eup %483 }
  0x8a   :  { %74 = vst.msk [vmem:[#allocation2 + $0xa] sm:$0xff] %vm72_vm2, %v63_v8  ;;  %85 = vrot.lane.b32.xlu2 %v608_v10, %s561_s1  ;;  %v359_v27 = vadd.f32 1.0, %v484_v7  ;;  %v486_v28 = vpop.eup %485 }
  0x8b   :  { %v204_v38 = vmul.f32 0.6931472, %v486_v28 }
  0x8c   :  { %487 = vlog2.f32 %v359_v27 }
  0x90   :  { %v618_v13 = vld [vmem:[#allocation2 + $0x28] sm:$0xf]  ;;  %v621_v14 = vld [vmem:[#allocation2 + $0x20] sm:$0xff] }
  0x91   :  { %v611_v11 = vld [vmem:[#allocation2 + $0x10] sm:$0xf]  ;;  %97 = vrot.lane.b32.xlu1 %v608_v10, %s562_s21  ;;  %v614_v12 = vld [vmem:[#allocation2 + $0x8] sm:$0xff] }
  0x92   :  { %89 = vrot.lane.b32.xlu0 %v611_v11, %s561_s1  ;;  %87 = vrot.lane.b32.xlu2 %v614_v12, %s561_s1 }
  0x99   :  { %259 = vrot.lane.b32.xlu1 %v605_v9, %s562_s21 }
  0x9a   :  { %251 = vrot.lane.b32.xlu0 %v618_v13, %s561_s1  ;;  %249 = vrot.lane.b32.xlu2 %v621_v14, %s561_s1 }
  0xa1   :  { %109 = vrot.lane.b32.xlu1 %v608_v10, %s563_s22 }
  0xa2   :  { %101 = vrot.lane.b32.xlu0 %v611_v11, %s562_s21  ;;  %99 = vrot.lane.b32.xlu2 %v614_v12, %s562_s21 }
  0xa9   :  { %271 = vrot.lane.b32.xlu1 %v605_v9, %s563_s22 }
  0xaa   :  { %263 = vrot.lane.b32.xlu0 %v618_v13, %s562_s21  ;;  %261 = vrot.lane.b32.xlu2 %v621_v14, %s562_s21 }
  0xb1   :  { %121 = vrot.lane.b32.xlu1 %v608_v10, %s564_s23 }
  0xb2   :  { %113 = vrot.lane.b32.xlu0 %v611_v11, %s563_s22  ;;  %111 = vrot.lane.b32.xlu2 %v614_v12, %s563_s22 }
  0xb9   :  { %283 = vrot.lane.b32.xlu1 %v605_v9, %s564_s23 }
  0xba   :  { %275 = vrot.lane.b32.xlu0 %v618_v13, %s563_s22  ;;  %273 = vrot.lane.b32.xlu2 %v621_v14, %s563_s22 }
  0xc2   :  { %125 = vrot.lane.b32.xlu0 %v611_v11, %s564_s23  ;;  %123 = vrot.lane.b32.xlu2 %v614_v12, %s564_s23 }
  0xca   :  { %287 = vrot.lane.b32.xlu0 %v618_v13, %s564_s23  ;;  %285 = vrot.lane.b32.xlu2 %v621_v14, %s564_s23 }
  0xe4   :  { %v641_v15 = vpop.permute.xlu2 %85 }
  0xe5   :  { %v94_v20 = vadd.f32 %v641_v15, %v608_v10 }
  0xec   :  { %v643_v16 = vpop.permute.xlu2 %87 }
  0xed   :  { %v95_v25 = vadd.f32 %v643_v16, %v614_v12  ;;  %v217_v12 = vsub.f32 0.0, %v686_v31 }
  0xef   :  { %v726_v61 = vsel %vm221_vm3, %v217_v12, %v211_v44 }
  0xf4   :  { %v645_v19 = vpop.permute.xlu2 %249 }
  0xf5   :  { %v257_v41 = vadd.f32 %v645_v19, %v621_v14  ;;  %v376_v14 = vsub.f32 0.0, %v692_v33  ;;  %v227_v33 = vmul.f32 1.5, %v726_v61 }
  0xfb   :  { %v650_v24 = vpop.permute.xlu1 %247 }
  0xfc   :  { %v654_v26 = vpop.permute.xlu2 %99  ;;  %v256_v42 = vadd.f32 %v650_v24, %v605_v9  ;;  %v488_v9 = vpop.eup %487  ;;  %v710_v24 = vadd.f32 %v208_v39, %v204_v38 }
  0xfd   :  { %v107_v10 = vadd.f32 %v654_v26, %v95_v25  ;;  %v712_v26 = vadd.f32 %v214_v40, %v204_v38  ;;  %v363_v52 = vmul.f32 0.6931472, %v488_v9 }
 0x103   :  { %v657_v34 = vpop.permute.xlu1 %97 }
 0x104   :  { %v661_v36 = vpop.permute.xlu0 %89  ;;  %v663_v37 = vpop.permute.xlu2 %261  ;;  %v106_v15 = vadd.f32 %v657_v34, %v94_v20  ;;  %v367_v34 = vmax.f32 %v365_v43, 0.0 }
 0x105   :  { %v269_v50 = vadd.f32 %v663_v37, %v257_v41  ;;  %v734_v37 = vsel %vm380_vm4, %v376_v14, %v370_v35  ;;  %v96_v39 = vadd.f32 %v661_v36, %v611_v11 }
 0x106   :  { %v738_v48 = vadd.f32 %v367_v34, %v363_v52  ;;  %v384_v62 = vadd.f32 %v734_v37, %v726_v61 }
 0x108   :  { %v371_v6 = vsub.f32 0.0, %v738_v48  ;;  %v397_v20 = vsel %vm396_vm8, %v384_v62, 0.0 }
 0x10b   :  { %v666_v45 = vpop.permute.xlu1 %259 }
 0x10c   :  { %v668_v46 = vpop.permute.xlu0 %251  ;;  %v670_v47 = vpop.permute.xlu2 %111  ;;  %v268_v53 = vadd.f32 %v666_v45, %v256_v42  ;;  %v212_v45 = vsub.f32 0.0, %v710_v24 }
 0x10d   :  { %v119_v54 = vadd.f32 %v670_v47, %v107_v10  ;;  %v218_v47 = vsub.f32 0.0, %v712_v26  ;;  %v258_v62 = vadd.f32 %v668_v46, %v618_v13 }
 0x10f   :  { %v757_v27 = vsel %vm222_vm5, %v218_v47, %v212_v45  ;;  %v220_v61 = vadd.f32 %v218_v47, %v212_v45 }
 0x113   :  { %v110_v55 = vpop.permute.xlu1 %109 }
 0x114   :  { %v675_v57 = vpop.permute.xlu0 %101  ;;  %v274_v58 = vpop.permute.xlu2 %273  ;;  %v118_v51 = vadd.f32 %v110_v55, %v106_v15  ;;  %v740_v55 = vadd.f32 %v373_v49, %v363_v52 }
 0x115   :  { %v281_v56 = vadd.f32 %v274_v58, %v269_v50  ;;  %v108_v15 = vadd.f32 %v675_v57, %v96_v39 }
 0x116   :  { %v377_v7 = vsub.f32 0.0, %v740_v55 }
 0x11b   :  { %v272_v8 = vpop.permute.xlu1 %271 }
 0x11c   :  { %v681_v22 = vpop.permute.xlu0 %263  ;;  %v124_v29 = vpop.permute.xlu2 %123  ;;  %v280_v63 = vadd.f32 %v272_v8, %v268_v53  ;;  %v763_v8 = vsel %vm381_vm6, %v377_v7, %v371_v6 }
 0x11d   :  { %v742_v58 = vadd.f32 %v124_v29, %v119_v54  ;;  %v385_v29 = vadd.f32 %v763_v8, %v757_v27  ;;  %v387_v30 = vmul.f32 1.5, %v763_v8 }
 0x11f   :  { %v138_v28 = vrot.slane %v742_v58, 1  ;;  %v398_v42 = vsel %vm396_vm8, %v385_v29, 0.0  ;;  %v148_v11 = vrot.slane %v742_v58, 2  ;;  %v168_v46 = vrot.slane %v742_v58, 4 }
 0x120   :  { %v399_v10 = vadd.f32 %v398_v42, %v397_v20 }
 0x122   :  { %400 = vadd.xlane.f32.xlu1 %v399_v10 }
 0x123   :  { %v122_v16 = vpop.permute.xlu1 %121 }
 0x124   :  { %v114_v19 = vpop.permute.xlu0 %113  ;;  %v718_v59 = vadd.f32 %v122_v16, %v118_v51  ;;  %v286_v60 = vpop.permute.xlu2 %285 }
 0x125   :  { %v748_v5 = vadd.f32 %v286_v60, %v281_v56  ;;  %v120_v36 = vadd.f32 %v114_v19, %v108_v15 }
 0x126   :  { %v137_v17 = vrot.slane %v718_v59, 1  ;;  %v147_v16 = vrot.slane %v718_v59, 2  ;;  %v157_v54 = vrot.slane %v718_v59, 3  ;;  %v167_v39 = vrot.slane %v718_v59, 4 }
 0x127   :  { %v299_v25 = vrot.slane %v748_v5, 1  ;;  %v308_v9 = vrot.slane %v748_v5, 2  ;;  %v317_v57 = vrot.slane %v748_v5, 3 }
 0x128   :  { %v139_v40 = vsel %vm136_vm7, %v137_v17, %v138_v28  ;;  %v149_v60 = vsel %vm146_vm9, %v147_v16, %v148_v11 }
 0x129   :  { %v144_v49 = vadd.f32 %v139_v40, %v718_v59 }
 0x12b   :  { %v284_v18 = vpop.permute.xlu1 %283  ;;  %v154_v17 = vadd.f32 %v149_v60, %v144_v49 }
 0x12c   :  { %v276_v21 = vpop.permute.xlu0 %275  ;;  %v292_v23 = vadd.f32 %v284_v18, %v280_v63  ;;  %v158_v63 = vrot.slane %v742_v58, 3 }
 0x12e   :  { %v298_v38 = vrot.slane %v292_v23, 1  ;;  %v307_v41 = vrot.slane %v292_v23, 2  ;;  %v316_v50 = vrot.slane %v292_v23, 3  ;;  %v325_v19 = vrot.slane %v292_v23, 4 }
 0x12f   :  { %v159_v13 = vsel %vm156_vm10, %v157_v54, %v158_v63  ;;  %v176_v54 = vmul.f32 25.0, %v593_v2 }
 0x130   :  { %v300_v43 = vsel %vm136_vm7, %v298_v38, %v299_v25  ;;  %v309_v51 = vsel %vm146_vm9, %v307_v41, %v308_v9  ;;  %v318_v20 = vsel %vm156_vm10, %v316_v50, %v317_v57  ;;  %v270_v38 = vadd.f32 %v681_v22, %v258_v62 }
 0x131   :  { %v305_v34 = vadd.f32 %v300_v43, %v292_v23  ;;  %v326_v41 = vrot.slane %v748_v5, 4  ;;  %v164_v10 = vadd.f32 %v159_v13, %v154_v17 }
 0x132   :  { %v282_v15 = vadd.f32 %v276_v21, %v270_v38 }
 0x133   :  { %v314_v53 = vadd.f32 %v309_v51, %v305_v34  ;;  %v327_v59 = vsel %vm166_vm11, %v325_v19, %v326_v41 }
 0x134   :  { %v126_v52 = vpop.permute.xlu0 %125 }
 0x135   :  { %v132_v56 = vadd.f32 %v126_v52, %v120_v36  ;;  %v323_v40 = vadd.f32 %v318_v20, %v314_v53  ;;  %v169_v52 = vsel %vm166_vm11, %v167_v39, %v168_v46 }
 0x137   :  { %v140_v18 = vrot.slane %v132_v56, 1  ;;  %v150_v29 = vrot.slane %v132_v56, 2  ;;  %v160_v43 = vrot.slane %v132_v56, 3  ;;  %v170_v22 = vrot.slane %v132_v56, 4 }
 0x138   :  { %v332_v36 = vadd.f32 %v327_v59, %v323_v40  ;;  %v378_v56 = vadd.f32 %v376_v14, %v370_v35  ;;  %v219_v35 = vadd.f32 %v217_v12, %v211_v44  ;;  %v379_v44 = vadd.f32 %v377_v7, %v371_v6 }
 0x139   :  { %v141_v42 = vsel %vm136_vm7, %v138_v28, %v140_v18  ;;  %v151_v16 = vsel %vm146_vm9, %v148_v11, %v150_v29  ;;  %v334_v28 = vmul.f32 25.0, %v591_v1  ;;  %v161_v51 = vsel %vm156_vm10, %v158_v63, %v160_v43 }
 0x13a   :  { %v145_v23 = vadd.f32 %v141_v42, %v742_v58  ;;  %v174_v58 = vadd.f32 %v169_v52, %v164_v10  ;;  %v171_v11 = vsel %vm166_vm11, %v168_v46, %v170_v22  ;;  %v386_v1 = vmul.f32 1.5, %v734_v37 }
 0x13b   :  { %v177_v63 = vmul.f32 25.0, %v599_v4  ;;  %v336_v17 = vsub.f32 %v334_v28, %v332_v36  ;;  %v389_v47 = vsub.f32 %v379_v44, %v387_v30 }
 0x13c   :  { %v288_v34 = vpop.permute.xlu0 %287  ;;  %v155_v49 = vadd.f32 %v151_v16, %v145_v23  ;;  %v178_v29 = vsub.f32 %v176_v54, %v174_v58  ;;  %v388_v37 = vsub.f32 %v378_v56, %v386_v1 }
 0x13d   :  { %v294_v50 = vadd.f32 %v288_v34, %v282_v15  ;;  %vm338_vm12 = vcmp.ne.f32.partialorder %v336_v17, 0.0 }
 0x13e   :  { %v165_v53 = vadd.f32 %v161_v51, %v155_v49  ;;  %vm180_vm13 = vcmp.ne.f32.partialorder %v178_v29, 0.0 }
 0x13f   :  { %v301_v21 = vrot.slane %v294_v50, 1  ;;  %v310_v60 = vrot.slane %v294_v50, 2  ;;  %v319_v2 = vrot.slane %v294_v50, 3  ;;  %v328_v32 = vrot.slane %v294_v50, 4 }
 0x140   :  { %v175_v62 = vadd.f32 %v171_v11, %v165_v53  ;;  %v182_v24 = vsel %vm180_vm13, 1.0, %v559_v0 }
 0x141   :  { %v302_v19 = vsel %vm136_vm7, %v299_v25, %v301_v21  ;;  %v311_v20 = vsel %vm146_vm9, %v308_v9, %v310_v60  ;;  %v228_v25 = vmul.f32 1.5, %v757_v27  ;;  %v320_v38 = vsel %vm156_vm10, %v317_v57, %v319_v2 }
 0x142   :  { %v306_v18 = vadd.f32 %v302_v19, %v748_v5  ;;  %v179_v4 = vsub.f32 %v177_v63, %v175_v62  ;;  %v335_v5 = vmul.f32 25.0, %v597_v3  ;;  %v329_v12 = vsel %vm166_vm11, %v326_v41, %v328_v32 }
 0x143   :  { %v340_v27 = vsel %vm338_vm12, 1.0, %v559_v0  ;;  %v229_v9 = vsub.f32 %v219_v35, %v227_v33  ;;  %v230_v45 = vsub.f32 %v220_v61, %v228_v25 }
 0x144   :  { %v315_v14 = vadd.f32 %v311_v20, %v306_v18  ;;  %vm181_vm14 = vcmp.ne.f32.partialorder %v179_v4, 0.0  ;;  %v390_v8 = vmul.f32 %v388_v37, %v340_v27  ;;  %v394_v48 = vadd.f32 %v340_v27, %v182_v24 }
 0x145   :  { %v183_v57 = vsel %vm181_vm14, 1.0, %v559_v0  ;;  %v231_v39 = vmul.f32 %v229_v9, %v182_v24 }
 0x146   :  { %v324_v31 = vadd.f32 %v320_v38, %v315_v14  ;;  %v232_v7 = vmul.f32 %v230_v45, %v183_v57  ;;  %v425_v42 = vsel %vm396_vm8, %v394_v48, 0.0 }
 0x147   :  { %v392_v41 = vadd.f32 %v390_v8, %v231_v39 }
 0x148   :  { %v333_v3 = vadd.f32 %v329_v12, %v324_v31 }
 0x149   :  { %v411_v23 = vsel %vm396_vm8, %v392_v41, 0.0 }
 0x14a   :  { %v337_v26 = vsub.f32 %v335_v5, %v333_v3 }
 0x14c   :  { %vm339_vm15 = vcmp.ne.f32.partialorder %v337_v26, 0.0 }
 0x14d   :  { %v341_v55 = vsel %vm339_vm15, 1.0, %v559_v0 }
 0x14e   :  { %v395_v6 = vadd.f32 %v341_v55, %v183_v57  ;;  %v391_v40 = vmul.f32 %v389_v47, %v341_v55 }
 0x150   :  { %v426_v43 = vsel %vm396_vm8, %v395_v6, 0.0  ;;  %v393_v13 = vadd.f32 %v391_v40, %v232_v7 }
 0x151   :  { %v427_v46 = vadd.f32 %v426_v43, %v425_v42 }
 0x152   :  { %v412_v10 = vsel %vm396_vm8, %v393_v13, 0.0 }
 0x153   :  { %428 = vadd.xlane.f32.xlu0 %v427_v46  ;;  %v413_v15 = vadd.f32 %v412_v10, %v411_v23 }
 0x155   :  { %414 = vadd.xlane.f32.xlu2 %v413_v15 }
 0x195   :  { %v401_v16 = vpop.xlane.xlu1 %400 }
 0x196   :  { %v402_v22 = vrot.slane %v401_v16, 4 }
 0x198   :  { %v403_v0 = vadd.f32 %v402_v22, %v401_v16 }
 0x19a   :  { %v404_v59 = vrot.slane %v403_v0, 2 }
 0x19c   :  { %v405_v34 = vadd.f32 %v404_v59, %v403_v0 }
 0x19e   :  { %v406_v49 = vrot.slane %v405_v34, 1 }
 0x1a0   :  { %v407_v36 = vadd.f32 %v406_v49, %v405_v34 }
 0x1a2   :  { %456 = vpush %v407_v36 }
 0x1c6   :  { %v429_v28 = vpop.xlane.xlu0 %428 }
 0x1c7   :  { %v430_v50 = vrot.slane %v429_v28, 4 }
 0x1c8   :  { %v415_v51 = vpop.xlane.xlu2 %414 }
 0x1c9   :  { %v431_v52 = vadd.f32 %v430_v50, %v429_v28  ;;  %v416_v53 = vrot.slane %v415_v51, 4 }
 0x1cb   :  { %v432_v58 = vrot.slane %v431_v52, 2  ;;  %v417_v54 = vadd.f32 %v416_v53, %v415_v51 }
 0x1cd   :  { %v433_v21 = vadd.f32 %v432_v58, %v431_v52  ;;  %v418_v60 = vrot.slane %v417_v54, 2 }
 0x1cf   :  { %v419_v11 = vadd.f32 %v418_v60, %v417_v54  ;;  %v434_v56 = vrot.slane %v433_v21, 1 }
 0x1d1   :  { %v420_v1 = vrot.slane %v419_v11, 1  ;;  %v435_v63 = vadd.f32 %v434_v56, %v433_v21 }
 0x1d3   :  { %v421_v62 = vadd.f32 %v420_v1, %v419_v11  ;;  %s457_s24 = spop %456 }
 0x1d4   :  { %410 = sst [smem:[#allocation8]] %s457_s24 }
 0x1d5   :  { %458 = vpush %v421_v62 }
 0x1d6   :  { %460 = vpush %v435_v63 }
 0x206   :  { %s459_s28 = spop %458 }
 0x207   :  { %424 = sst [smem:[#allocation8 + $0x1]] %s459_s28  ;;  %s461_s29 = spop %460 }
 0x208   :  { %438 = sst [smem:[#allocation8 + $0x2]] %s461_s29 }
 0x209   :  { %447 = dma.smem_to_vmem %s565_s30, 16, %s445_s27, [#allocation5]  }
 0x20a   :  { %553 = dma.done.wait [#allocation5], 16  }
 0x20b   :  { %554 = vsyncadd [#allocation5], 4294967280 }
 0x20c   :  { %452 = sfence }
 0x20d   :  { %453 = vsyncpa [#allocation4], 1 }
 0x20e   :  { %454 = vsyncpa [#allocation7], 1 }
 0x20f   :  { %455 = vsyncpa [#allocation5], 1 }

</bundles_post_ra>
